<compile_context>
chip_gen: v7x
topology: tpu7x:2x2x1
jax: 0.10.0
libtpu: 0.0.40
codegen_flags: <defaults>
</compile_context>

<pallas_src>
import functools

import jax
import jax.numpy as jnp
from jax.experimental import pallas as pl
from jax.experimental.pallas import tpu as pltpu


def _dconv_kernel(x_ref, lnw_ref, lnb_ref, w1_ref, b1_ref, w2_ref, b2_ref,
                  o_ref, *, eps):
    nb, H, Kin = x_ref.shape
    M = nb * H

    # --- LayerNorm per sample over its (H, W*Cin) slab: centred two-pass ---
    x = x_ref[...].astype(jnp.float32)                       # (nb, H, Kin)
    inv_n = 1.0 / float(H * Kin)
    mean = jnp.sum(jnp.sum(x, axis=2, keepdims=True), axis=1, keepdims=True) * inv_n
    xc = x - mean
    var = jnp.sum(jnp.sum(xc * xc, axis=2, keepdims=True), axis=1, keepdims=True) * inv_n
    xn = xc * jax.lax.rsqrt(var + eps)
    xn = xn * lnw_ref[...][None] + lnb_ref[...][None]

    # Flatten samples into the matmul M dimension; everything below is
    # row-independent (per-sample rows never mix thanks to the masks).
    h = xn.reshape(M, Kin)

    # Row-within-sample index (provenance label for the rotates).
    y = jax.lax.broadcasted_iota(jnp.int32, (nb, H, 1), 1).reshape(M, 1)
    y_a = pltpu.roll(y, 1, 0)                 # label travels with rotate dir A
    y_b = pltpu.roll(y, M - 1, 0)             # label travels with rotate dir B
    # Accept rotated data only if it came from row y-1 / y+1 of the same sample:
    # conv zero-padding at the top/bottom rows and cross-sample isolation fall
    # out of the same select, independent of the hardware rotate convention.
    a_is_m1, b_is_m1 = (y_a == y - 1), (y_b == y - 1)
    a_is_p1, b_is_p1 = (y_a == y + 1), (y_b == y + 1)

    def conv(h, w_ref, b_ref):
        # h: (M, K) f32.  w_ref: (3, K, W*Cout) banded taps (kh = 0, 1, 2).
        h_a = pltpu.roll(h, 1, 0)             # XLU sublane rotate
        h_b = pltpu.roll(h, M - 1, 0)
        hm1 = jnp.where(a_is_m1, h_a, 0.0) + jnp.where(b_is_m1, h_b, 0.0)
        hp1 = jnp.where(a_is_p1, h_a, 0.0) + jnp.where(b_is_p1, h_b, 0.0)
        w0, w1, w2 = w_ref[0], w_ref[1], w_ref[2]
        mm = lambda a, w: jnp.dot(a.astype(w.dtype), w,
                                  preferred_element_type=jnp.float32)
        acc = mm(hm1, w0) + mm(h, w1) + mm(hp1, w2)
        return acc + b_ref[...]               # (1, W*Cout) broadcast, f32

    h = conv(h, w1_ref, b1_ref)
    h = h * jax.nn.sigmoid(h)                 # SiLU (EUP), f32
    h = conv(h, w2_ref, b2_ref)
    h = h * jax.nn.sigmoid(h)

    o_ref[...] = h.reshape(nb, H, -1).astype(o_ref.dtype)   # lane-dense store


def _banded_weights(w, W, dtype):
    """Fold kw taps + x-direction zero padding into 3 banded matrices.

    w: (Cout, Cin, 3, 3) PyTorch OIHW conv weight.
    Returns B of shape (3, W*Cin, W*Cout) such that for each kh the conv
    contribution is  row_shifted_input(M, W*Cin) @ B[kh].
    Quantised to `dtype` AFTER the tap-mixing einsum.
    """
    Cout, Cin = w.shape[0], w.shape[1]
    x_in = jnp.arange(W)[:, None, None]
    x_out = jnp.arange(W)[None, :, None]
    dx = jnp.arange(3)[None, None, :]
    sel = (x_in == x_out + dx - 1).astype(jnp.float32)        # (W, W, 3)
    w_t = jnp.transpose(w, (2, 3, 1, 0)).astype(jnp.float32)  # (kh, kw, Cin, Cout)
    b = jnp.einsum('aok,dkic->daioc', sel, w_t)               # (3, W, Cin, W, Cout)
    return b.reshape(3, W * Cin, W * Cout).astype(dtype)


def dconv_block_forward(x_nchw, params, *, eps=1e-5,
                        matmul_dtype=jnp.bfloat16, io_dtype=jnp.bfloat16):
    """Pallas forward matching DConvBlock(shape=(C,H,W), in_c=C, out_c=Cout)."""
    N, Cin, H, W = x_nchw.shape
    Cout = params["w1"].shape[0]
    Kin, Kout = W * Cin, W * Cout

    # Lane-dense re-layout (plain-JAX glue outside the kernel).
    # TODO(synk): if the surrounding model can provide NHWC / consume the
    # (N, H, W*C) slab directly, drop these transposes — at these sizes they cost
    # as much HBM traffic as the kernel itself.
    x2d = jnp.transpose(x_nchw, (0, 2, 3, 1)).reshape(N, H, Kin).astype(io_dtype)
    lnw = jnp.transpose(params["ln_w"], (1, 2, 0)).reshape(H, Kin).astype(jnp.float32)
    lnb = jnp.transpose(params["ln_b"], (1, 2, 0)).reshape(H, Kin).astype(jnp.float32)

    w1b = _banded_weights(params["w1"], W, matmul_dtype)      # (3, Kin,  Kout)
    w2b = _banded_weights(params["w2"], W, matmul_dtype)      # (3, Kout, Kout)
    b1r = jnp.tile(params["b1"].astype(jnp.float32), (W,)).reshape(1, Kout)
    b2r = jnp.tile(params["b2"].astype(jnp.float32), (W,)).reshape(1, Kout)

    # Samples per grid step: target ~256 matmul rows, but keep >= 2 grid steps so
    # v7x's two TensorCores both get work (no-op on single-TC v5e/v6e).
    nb = min(N, max(1, 256 // H))
    while nb > 1 and pl.cdiv(N, nb) < 2:
        nb = pl.cdiv(nb, 2)
    n_pad = pl.cdiv(N, nb) * nb
    if n_pad != N:
        x2d = jnp.pad(x2d, ((0, n_pad - N), (0, 0), (0, 0)))

    out2d = pl.pallas_call(
        functools.partial(_dconv_kernel, eps=eps),
        out_shape=jax.ShapeDtypeStruct((n_pad, H, Kout), io_dtype),
        grid=(n_pad // nb,),
        in_specs=[
            pl.BlockSpec((nb, H, Kin), lambda n: (n, 0, 0)),
            pl.BlockSpec((H, Kin), lambda n: (0, 0)),
            pl.BlockSpec((H, Kin), lambda n: (0, 0)),
            pl.BlockSpec((3, Kin, Kout), lambda n: (0, 0, 0)),
            pl.BlockSpec((1, Kout), lambda n: (0, 0)),
            pl.BlockSpec((3, Kout, Kout), lambda n: (0, 0, 0)),
            pl.BlockSpec((1, Kout), lambda n: (0, 0)),
        ],
        out_specs=pl.BlockSpec((nb, H, Kout), lambda n: (n, 0, 0)),
        compiler_params=pltpu.CompilerParams(
            dimension_semantics=("parallel",)),   # batch axis -> both TCs on v7x
    )(x2d, lnw, lnb, w1b, b1r, w2b, b2r)

    out = out2d[:N].reshape(N, H, W, Cout)
    return jnp.transpose(out, (0, 3, 1, 2)).astype(x_nchw.dtype)   # back to NCHW


def _reference_forward(x, params, eps=1e-5):
    """Pure-JAX reference (mirrors the PyTorch module)."""
    mean = jnp.mean(x, axis=(1, 2, 3), keepdims=True)
    var = jnp.mean((x - mean) ** 2, axis=(1, 2, 3), keepdims=True)
    out = (x - mean) / jnp.sqrt(var + eps)
    out = out * params["ln_w"][None] + params["ln_b"][None]

    def conv(o, w, b):
        y = jax.lax.conv_general_dilated(
            o, w, window_strides=(1, 1), padding=((1, 1), (1, 1)),
            dimension_numbers=("NCHW", "OIHW", "NCHW"))
        return y + b[None, :, None, None]

    out = conv(out, params["w1"], params["b1"])
    out = out * jax.nn.sigmoid(out)
    out = conv(out, params["w2"], params["b2"])
    out = out * jax.nn.sigmoid(out)
    return out


if __name__ == "__main__":
    # Small shapes consistent with the module: DConvBlock(shape=(C,H,W), in_c=C, out_c)
    N, Cin, H, W = 2, 4, 16, 16
    Cout = 8

    key = jax.random.PRNGKey(0)
    kx, k1, k2, k3, k4, k5, k6 = jax.random.split(key, 7)

    x = jax.random.normal(kx, (N, Cin, H, W), dtype=jnp.float32)
    params = {
        "ln_w": jax.random.normal(k1, (Cin, H, W), dtype=jnp.float32) * 0.1 + 1.0,
        "ln_b": jax.random.normal(k2, (Cin, H, W), dtype=jnp.float32) * 0.1,
        "w1": jax.random.normal(k3, (Cout, Cin, 3, 3), dtype=jnp.float32) * 0.2,
        "b1": jax.random.normal(k4, (Cout,), dtype=jnp.float32) * 0.1,
        "w2": jax.random.normal(k5, (Cout, Cout, 3, 3), dtype=jnp.float32) * 0.2,
        "b2": jax.random.normal(k6, (Cout,), dtype=jnp.float32) * 0.1,
    }

    ref = jax.block_until_ready(_reference_forward(x, params))

    # 1) Tight structural check: all-f32 variant of the same kernel.
    out_f32 = jax.block_until_ready(
        dconv_block_forward(x, params,
                            matmul_dtype=jnp.float32, io_dtype=jnp.float32))
    assert out_f32.shape == (N, Cout, H, W), out_f32.shape
    err_f32 = float(jnp.max(jnp.abs(out_f32 - ref)))
    assert err_f32 < 1e-3, f"f32 kernel mismatch vs reference: max |err| = {err_f32}"

    # 2) Default perf path: bf16 MXU operands + bf16 activation I/O slab
    #    (f32 accumulation & elementwise), checked at bf16-appropriate tolerance.
    out_bf16 = jax.block_until_ready(dconv_block_forward(x, params))
    assert out_bf16.shape == (N, Cout, H, W), out_bf16.shape
    err_bf16 = float(jnp.max(jnp.abs(out_bf16 - ref)))
    assert err_bf16 < 1e-1, f"bf16 kernel mismatch vs reference: max |err| = {err_bf16}"

    print("KERNEL_OK")
</pallas_src>

<mosaic_0001>
module attributes {stable_mosaic.version = 11 : i64} {
  func.func @_dconv_kernel(%arg0: i32, %arg1: memref<1x16x64xf32, #tpu.memory_space<vmem>>, %arg2: memref<16x64xf32, #tpu.memory_space<vmem>>, %arg3: memref<16x64xf32, #tpu.memory_space<vmem>>, %arg4: memref<3x64x128xf32, #tpu.memory_space<vmem>>, %arg5: memref<1x128xf32, #tpu.memory_space<vmem>>, %arg6: memref<3x128x128xf32, #tpu.memory_space<vmem>>, %arg7: memref<1x128xf32, #tpu.memory_space<vmem>>, %arg8: memref<1x16x128xf32, #tpu.memory_space<vmem>>) attributes {dimension_semantics = [#tpu.dimension_semantics<parallel>], iteration_bounds = array<i64: 2>, scalar_prefetch = 0 : i64, scratch_operands = 0 : i64, tpu.core_type = #tpu.core_type<tc>, window_params = [{transform_indices = @transform_0, window_bounds = array<i64: 1, 16, 64>}, {pipeline_mode = #tpu.pipeline_mode<synchronous>, transform_indices = @transform_1, window_bounds = array<i64: 16, 64>}, {pipeline_mode = #tpu.pipeline_mode<synchronous>, transform_indices = @transform_2, window_bounds = array<i64: 16, 64>}, {pipeline_mode = #tpu.pipeline_mode<synchronous>, transform_indices = @transform_3, window_bounds = array<i64: 3, 64, 128>}, {pipeline_mode = #tpu.pipeline_mode<synchronous>, transform_indices = @transform_4, window_bounds = array<i64: 1, 128>}, {pipeline_mode = #tpu.pipeline_mode<synchronous>, transform_indices = @transform_5, window_bounds = array<i64: 3, 128, 128>}, {pipeline_mode = #tpu.pipeline_mode<synchronous>, transform_indices = @transform_6, window_bounds = array<i64: 1, 128>}, {transform_indices = @transform_7, window_bounds = array<i64: 1, 16, 128>}]} {
    %c0 = arith.constant 0 : index
    %c0_0 = arith.constant 0 : index
    %c0_1 = arith.constant 0 : index
    %0 = vector.load %arg1[%c0, %c0_0, %c0_1] : memref<1x16x64xf32, #tpu.memory_space<vmem>>, vector<1x16x64xf32>
    %cst = arith.constant dense<0.000000e+00> : vector<1x16xf32>
    %1 = vector.multi_reduction <add>, %0, %cst [2] : vector<1x16x64xf32> to vector<1x16xf32>
    %2 = vector.shape_cast %1 : vector<1x16xf32> to vector<1x16x1xf32>
    %cst_2 = arith.constant dense<0.000000e+00> : vector<1x1xf32>
    %3 = vector.multi_reduction <add>, %2, %cst_2 [1] : vector<1x16x1xf32> to vector<1x1xf32>
    %4 = vector.shape_cast %3 : vector<1x1xf32> to vector<1x1x1xf32>
    %cst_3 = arith.constant 9.765625E-4 : f32
    %5 = vector.broadcast %cst_3 : f32 to vector<1x1x1xf32>
    %6 = arith.mulf %4, %5 : vector<1x1x1xf32>
    %7 = vector.broadcast %6 : vector<1x1x1xf32> to vector<1x16x64xf32>
    %8 = arith.subf %0, %7 : vector<1x16x64xf32>
    %9 = arith.mulf %8, %8 : vector<1x16x64xf32>
    %cst_4 = arith.constant dense<0.000000e+00> : vector<1x16xf32>
    %10 = vector.multi_reduction <add>, %9, %cst_4 [2] : vector<1x16x64xf32> to vector<1x16xf32>
    %11 = vector.shape_cast %10 : vector<1x16xf32> to vector<1x16x1xf32>
    %cst_5 = arith.constant dense<0.000000e+00> : vector<1x1xf32>
    %12 = vector.multi_reduction <add>, %11, %cst_5 [1] : vector<1x16x1xf32> to vector<1x1xf32>
    %13 = vector.shape_cast %12 : vector<1x1xf32> to vector<1x1x1xf32>
    %cst_6 = arith.constant 9.765625E-4 : f32
    %14 = vector.broadcast %cst_6 : f32 to vector<1x1x1xf32>
    %15 = arith.mulf %13, %14 : vector<1x1x1xf32>
    %cst_7 = arith.constant 9.99999974E-6 : f32
    %16 = vector.broadcast %cst_7 : f32 to vector<1x1x1xf32>
    %17 = arith.addf %15, %16 : vector<1x1x1xf32>
    %18 = math.rsqrt %17 : vector<1x1x1xf32>
    %19 = vector.broadcast %18 : vector<1x1x1xf32> to vector<1x16x64xf32>
    %20 = arith.mulf %8, %19 : vector<1x16x64xf32>
    %c0_8 = arith.constant 0 : index
    %c0_9 = arith.constant 0 : index
    %21 = vector.load %arg2[%c0_8, %c0_9] : memref<16x64xf32, #tpu.memory_space<vmem>>, vector<16x64xf32>
    %22 = vector.shape_cast %21 : vector<16x64xf32> to vector<1x16x64xf32>
    %23 = arith.mulf %20, %22 : vector<1x16x64xf32>
    %c0_10 = arith.constant 0 : index
    %c0_11 = arith.constant 0 : index
    %24 = vector.load %arg3[%c0_10, %c0_11] : memref<16x64xf32, #tpu.memory_space<vmem>>, vector<16x64xf32>
    %25 = vector.shape_cast %24 : vector<16x64xf32> to vector<1x16x64xf32>
    %26 = arith.addf %23, %25 : vector<1x16x64xf32>
    %27 = vector.shape_cast %26 : vector<1x16x64xf32> to vector<16x64xf32>
    %28 = tpu.iota {dimensions = array<i32: 1>} : vector<1x16x1xi32>
    %29 = vector.shape_cast %28 : vector<1x16x1xi32> to vector<16x1xi32>
    %c1_i32 = arith.constant 1 : i32
    %30 = tpu.dynamic_rotate %29 by %c1_i32 dim 0 : vector<16x1xi32>, i32 -> vector<16x1xi32>
    %c15_i32 = arith.constant 15 : i32
    %31 = tpu.dynamic_rotate %29 by %c15_i32 dim 0 : vector<16x1xi32>, i32 -> vector<16x1xi32>
    %c1_i32_12 = arith.constant 1 : i32
    %32 = vector.broadcast %c1_i32_12 : i32 to vector<16x1xi32>
    %33 = arith.subi %29, %32 : vector<16x1xi32>
    %34 = arith.cmpi eq, %30, %33 : vector<16x1xi32>
    %c1_i32_13 = arith.constant 1 : i32
    %35 = vector.broadcast %c1_i32_13 : i32 to vector<16x1xi32>
    %36 = arith.subi %29, %35 : vector<16x1xi32>
    %37 = arith.cmpi eq, %31, %36 : vector<16x1xi32>
    %c1_i32_14 = arith.constant 1 : i32
    %38 = vector.broadcast %c1_i32_14 : i32 to vector<16x1xi32>
    %39 = arith.addi %29, %38 : vector<16x1xi32>
    %40 = arith.cmpi eq, %30, %39 : vector<16x1xi32>
    %c1_i32_15 = arith.constant 1 : i32
    %41 = vector.broadcast %c1_i32_15 : i32 to vector<16x1xi32>
    %42 = arith.addi %29, %41 : vector<16x1xi32>
    %43 = arith.cmpi eq, %31, %42 : vector<16x1xi32>
    %c1_i32_16 = arith.constant 1 : i32
    %44 = tpu.dynamic_rotate %27 by %c1_i32_16 dim 0 : vector<16x64xf32>, i32 -> vector<16x64xf32>
    %c15_i32_17 = arith.constant 15 : i32
    %45 = tpu.dynamic_rotate %27 by %c15_i32_17 dim 0 : vector<16x64xf32>, i32 -> vector<16x64xf32>
    %cst_18 = arith.constant 0.000000e+00 : f32
    %46 = vector.shape_cast %34 : vector<16x1xi1> to vector<16x1xi1>
    %47 = vector.broadcast %46 : vector<16x1xi1> to vector<16x64xi1>
    %48 = vector.broadcast %cst_18 : f32 to vector<16x64xf32>
    %49 = arith.select %47, %44, %48 : vector<16x64xi1>, vector<16x64xf32>
    %cst_19 = arith.constant 0.000000e+00 : f32
    %50 = vector.shape_cast %37 : vector<16x1xi1> to vector<16x1xi1>
    %51 = vector.broadcast %50 : vector<16x1xi1> to vector<16x64xi1>
    %52 = vector.broadcast %cst_19 : f32 to vector<16x64xf32>
    %53 = arith.select %51, %45, %52 : vector<16x64xi1>, vector<16x64xf32>
    %54 = arith.addf %49, %53 : vector<16x64xf32>
    %cst_20 = arith.constant 0.000000e+00 : f32
    %55 = vector.shape_cast %40 : vector<16x1xi1> to vector<16x1xi1>
    %56 = vector.broadcast %55 : vector<16x1xi1> to vector<16x64xi1>
    %57 = vector.broadcast %cst_20 : f32 to vector<16x64xf32>
    %58 = arith.select %56, %44, %57 : vector<16x64xi1>, vector<16x64xf32>
    %cst_21 = arith.constant 0.000000e+00 : f32
    %59 = vector.shape_cast %43 : vector<16x1xi1> to vector<16x1xi1>
    %60 = vector.broadcast %59 : vector<16x1xi1> to vector<16x64xi1>
    %61 = vector.broadcast %cst_21 : f32 to vector<16x64xf32>
    %62 = arith.select %60, %45, %61 : vector<16x64xi1>, vector<16x64xf32>
    %63 = arith.addf %58, %62 : vector<16x64xf32>
    %c0_22 = arith.constant 0 : index
    %c0_23 = arith.constant 0 : index
    %c0_24 = arith.constant 0 : index
    %64 = vector.load %arg4[%c0_22, %c0_23, %c0_24] : memref<3x64x128xf32, #tpu.memory_space<vmem>>, vector<1x64x128xf32>
    %65 = vector.shape_cast %64 : vector<1x64x128xf32> to vector<64x128xf32>
    %c1 = arith.constant 1 : index
    %c0_25 = arith.constant 0 : index
    %c0_26 = arith.constant 0 : index
    %66 = vector.load %arg4[%c1, %c0_25, %c0_26] : memref<3x64x128xf32, #tpu.memory_space<vmem>>, vector<1x64x128xf32>
    %67 = vector.shape_cast %66 : vector<1x64x128xf32> to vector<64x128xf32>
    %c2 = arith.constant 2 : index
    %c0_27 = arith.constant 0 : index
    %c0_28 = arith.constant 0 : index
    %68 = vector.load %arg4[%c2, %c0_27, %c0_28] : memref<3x64x128xf32, #tpu.memory_space<vmem>>, vector<1x64x128xf32>
    %69 = vector.shape_cast %68 : vector<1x64x128xf32> to vector<64x128xf32>
    %cst_29 = arith.constant dense<0.000000e+00> : vector<16x128xf32>
    %70 = tpu.matmul %54, %65, %cst_29 {dimension_numbers = #tpu.dot_dimension_numbers<[1], [0], [0], [1], [0, 0, 1, 1], [], []>} : vector<16x64xf32>, vector<64x128xf32>, vector<16x128xf32> -> vector<16x128xf32>
    %cst_30 = arith.constant dense<0.000000e+00> : vector<16x128xf32>
    %71 = tpu.matmul %27, %67, %cst_30 {dimension_numbers = #tpu.dot_dimension_numbers<[1], [0], [0], [1], [0, 0, 1, 1], [], []>} : vector<16x64xf32>, vector<64x128xf32>, vector<16x128xf32> -> vector<16x128xf32>
    %72 = arith.addf %70, %71 : vector<16x128xf32>
    %cst_31 = arith.constant dense<0.000000e+00> : vector<16x128xf32>
    %73 = tpu.matmul %63, %69, %cst_31 {dimension_numbers = #tpu.dot_dimension_numbers<[1], [0], [0], [1], [0, 0, 1, 1], [], []>} : vector<16x64xf32>, vector<64x128xf32>, vector<16x128xf32> -> vector<16x128xf32>
    %74 = arith.addf %72, %73 : vector<16x128xf32>
    %c0_32 = arith.constant 0 : index
    %c0_33 = arith.constant 0 : index
    %75 = vector.load %arg5[%c0_32, %c0_33] : memref<1x128xf32, #tpu.memory_space<vmem>>, vector<1x128xf32>
    %76 = vector.broadcast %75 : vector<1x128xf32> to vector<16x128xf32>
    %77 = arith.addf %74, %76 : vector<16x128xf32>
    %78 = arith.negf %77 : vector<16x128xf32>
    %79 = math.exp %78 : vector<16x128xf32>
    %cst_34 = arith.constant 1.000000e+00 : f32
    %80 = vector.broadcast %cst_34 : f32 to vector<16x128xf32>
    %81 = arith.addf %80, %79 : vector<16x128xf32>
    %82 = arith.divf %80, %81 : vector<16x128xf32>
    %83 = arith.mulf %77, %82 : vector<16x128xf32>
    %c1_i32_35 = arith.constant 1 : i32
    %84 = tpu.dynamic_rotate %83 by %c1_i32_35 dim 0 : vector<16x128xf32>, i32 -> vector<16x128xf32>
    %c15_i32_36 = arith.constant 15 : i32
    %85 = tpu.dynamic_rotate %83 by %c15_i32_36 dim 0 : vector<16x128xf32>, i32 -> vector<16x128xf32>
    %cst_37 = arith.constant 0.000000e+00 : f32
    %86 = vector.shape_cast %34 : vector<16x1xi1> to vector<16x1xi1>
    %87 = vector.broadcast %86 : vector<16x1xi1> to vector<16x128xi1>
    %88 = vector.broadcast %cst_37 : f32 to vector<16x128xf32>
    %89 = arith.select %87, %84, %88 : vector<16x128xi1>, vector<16x128xf32>
    %cst_38 = arith.constant 0.000000e+00 : f32
    %90 = vector.shape_cast %37 : vector<16x1xi1> to vector<16x1xi1>
    %91 = vector.broadcast %90 : vector<16x1xi1> to vector<16x128xi1>
    %92 = vector.broadcast %cst_38 : f32 to vector<16x128xf32>
    %93 = arith.select %91, %85, %92 : vector<16x128xi1>, vector<16x128xf32>
    %94 = arith.addf %89, %93 : vector<16x128xf32>
    %cst_39 = arith.constant 0.000000e+00 : f32
    %95 = vector.shape_cast %40 : vector<16x1xi1> to vector<16x1xi1>
    %96 = vector.broadcast %95 : vector<16x1xi1> to vector<16x128xi1>
    %97 = vector.broadcast %cst_39 : f32 to vector<16x128xf32>
    %98 = arith.select %96, %84, %97 : vector<16x128xi1>, vector<16x128xf32>
    %cst_40 = arith.constant 0.000000e+00 : f32
    %99 = vector.shape_cast %43 : vector<16x1xi1> to vector<16x1xi1>
    %100 = vector.broadcast %99 : vector<16x1xi1> to vector<16x128xi1>
    %101 = vector.broadcast %cst_40 : f32 to vector<16x128xf32>
    %102 = arith.select %100, %85, %101 : vector<16x128xi1>, vector<16x128xf32>
    %103 = arith.addf %98, %102 : vector<16x128xf32>
    %c0_41 = arith.constant 0 : index
    %c0_42 = arith.constant 0 : index
    %c0_43 = arith.constant 0 : index
    %104 = vector.load %arg6[%c0_41, %c0_42, %c0_43] : memref<3x128x128xf32, #tpu.memory_space<vmem>>, vector<1x128x128xf32>
    %105 = vector.shape_cast %104 : vector<1x128x128xf32> to vector<128x128xf32>
    %c1_44 = arith.constant 1 : index
    %c0_45 = arith.constant 0 : index
    %c0_46 = arith.constant 0 : index
    %106 = vector.load %arg6[%c1_44, %c0_45, %c0_46] : memref<3x128x128xf32, #tpu.memory_space<vmem>>, vector<1x128x128xf32>
    %107 = vector.shape_cast %106 : vector<1x128x128xf32> to vector<128x128xf32>
    %c2_47 = arith.constant 2 : index
    %c0_48 = arith.constant 0 : index
    %c0_49 = arith.constant 0 : index
    %108 = vector.load %arg6[%c2_47, %c0_48, %c0_49] : memref<3x128x128xf32, #tpu.memory_space<vmem>>, vector<1x128x128xf32>
    %109 = vector.shape_cast %108 : vector<1x128x128xf32> to vector<128x128xf32>
    %cst_50 = arith.constant dense<0.000000e+00> : vector<16x128xf32>
    %110 = tpu.matmul %94, %105, %cst_50 {dimension_numbers = #tpu.dot_dimension_numbers<[1], [0], [0], [1], [0, 0, 1, 1], [], []>} : vector<16x128xf32>, vector<128x128xf32>, vector<16x128xf32> -> vector<16x128xf32>
    %cst_51 = arith.constant dense<0.000000e+00> : vector<16x128xf32>
    %111 = tpu.matmul %83, %107, %cst_51 {dimension_numbers = #tpu.dot_dimension_numbers<[1], [0], [0], [1], [0, 0, 1, 1], [], []>} : vector<16x128xf32>, vector<128x128xf32>, vector<16x128xf32> -> vector<16x128xf32>
    %112 = arith.addf %110, %111 : vector<16x128xf32>
    %cst_52 = arith.constant dense<0.000000e+00> : vector<16x128xf32>
    %113 = tpu.matmul %103, %109, %cst_52 {dimension_numbers = #tpu.dot_dimension_numbers<[1], [0], [0], [1], [0, 0, 1, 1], [], []>} : vector<16x128xf32>, vector<128x128xf32>, vector<16x128xf32> -> vector<16x128xf32>
    %114 = arith.addf %112, %113 : vector<16x128xf32>
    %c0_53 = arith.constant 0 : index
    %c0_54 = arith.constant 0 : index
    %115 = vector.load %arg7[%c0_53, %c0_54] : memref<1x128xf32, #tpu.memory_space<vmem>>, vector<1x128xf32>
    %116 = vector.broadcast %115 : vector<1x128xf32> to vector<16x128xf32>
    %117 = arith.addf %114, %116 : vector<16x128xf32>
    %118 = arith.negf %117 : vector<16x128xf32>
    %119 = math.exp %118 : vector<16x128xf32>
    %cst_55 = arith.constant 1.000000e+00 : f32
    %120 = vector.broadcast %cst_55 : f32 to vector<16x128xf32>
    %121 = arith.addf %120, %119 : vector<16x128xf32>
    %122 = arith.divf %120, %121 : vector<16x128xf32>
    %123 = arith.mulf %117, %122 : vector<16x128xf32>
    %124 = vector.shape_cast %123 : vector<16x128xf32> to vector<1x16x128xf32>
    %c0_56 = arith.constant 0 : index
    %c0_57 = arith.constant 0 : index
    %c0_58 = arith.constant 0 : index
    %125 = vector.load %arg8[%c0_56, %c0_57, %c0_58] : memref<1x16x128xf32, #tpu.memory_space<vmem>>, vector<1x16x128xf32>
    tpu.vector_store %arg8[%c0_56, %c0_57, %c0_58], %124 {strides = array<i32>} : memref<1x16x128xf32, #tpu.memory_space<vmem>>, vector<1x16x128xf32>,
    return
  }
  func.func @transform_0(%arg0: i32) -> (i32, i32, i32) {
    %c0_i32 = arith.constant 0 : i32
    %c0_i32_0 = arith.constant 0 : i32
    %c0_i32_1 = arith.constant 0 : i32
    return %arg0, %c0_i32, %c0_i32_0 : i32, i32, i32
  }
  func.func @transform_1(%arg0: i32) -> (i32, i32) {
    %c0_i32 = arith.constant 0 : i32
    %c0_i32_0 = arith.constant 0 : i32
    %c0_i32_1 = arith.constant 0 : i32
    return %c0_i32, %c0_i32_0 : i32, i32
  }
  func.func @transform_2(%arg0: i32) -> (i32, i32) {
    %c0_i32 = arith.constant 0 : i32
    %c0_i32_0 = arith.constant 0 : i32
    %c0_i32_1 = arith.constant 0 : i32
    return %c0_i32, %c0_i32_0 : i32, i32
  }
  func.func @transform_3(%arg0: i32) -> (i32, i32, i32) {
    %c0_i32 = arith.constant 0 : i32
    %c0_i32_0 = arith.constant 0 : i32
    %c0_i32_1 = arith.constant 0 : i32
    %c0_i32_2 = arith.constant 0 : i32
    return %c0_i32, %c0_i32_0, %c0_i32_1 : i32, i32, i32
  }
  func.func @transform_4(%arg0: i32) -> (i32, i32) {
    %c0_i32 = arith.constant 0 : i32
    %c0_i32_0 = arith.constant 0 : i32
    %c0_i32_1 = arith.constant 0 : i32
    return %c0_i32, %c0_i32_0 : i32, i32
  }
  func.func @transform_5(%arg0: i32) -> (i32, i32, i32) {
    %c0_i32 = arith.constant 0 : i32
    %c0_i32_0 = arith.constant 0 : i32
    %c0_i32_1 = arith.constant 0 : i32
    %c0_i32_2 = arith.constant 0 : i32
    return %c0_i32, %c0_i32_0, %c0_i32_1 : i32, i32, i32
  }
  func.func @transform_6(%arg0: i32) -> (i32, i32) {
    %c0_i32 = arith.constant 0 : i32
    %c0_i32_0 = arith.constant 0 : i32
    %c0_i32_1 = arith.constant 0 : i32
    return %c0_i32, %c0_i32_0 : i32, i32
  }
  func.func @transform_7(%arg0: i32) -> (i32, i32, i32) {
    %c0_i32 = arith.constant 0 : i32
    %c0_i32_0 = arith.constant 0 : i32
    %c0_i32_1 = arith.constant 0 : i32
    return %arg0, %c0_i32, %c0_i32_0 : i32, i32, i32
  }
}

</mosaic_0001>

<bundles_post_ra>
// kernel: tpu_custom_call.1
= control target key start
LH: loop header
LB: loop body
LE: loop exit
PB: predicated region body
PF: predicated region fallthrough
CT: control target
= control target key end

     0   :  { %12 = vsyncpa [#allocation3], 0  ;;  %s2446_s0 = inlined_call_operand.hbm [shape: f32[2,16,64], index: 0, kind: input, shape index: {}]   ;;  %s2447_s1 = inlined_call_operand.hbm [shape: f32[16,64], index: 1, kind: input, shape index: {}]   ;;  %s2448_s2 = inlined_call_operand.hbm [shape: f32[16,64], index: 2, kind: input, shape index: {}]   ;;  %s2449_s3 = inlined_call_operand.hbm [shape: f32[3,64,128], index: 3, kind: input, shape index: {}]   ;;  %s2450_s4 = inlined_call_operand.vmem [shape: f32[1,128], index: 4, kind: input, shape index: {}]   ;;  %s2451_s5 = inlined_call_operand.hbm [shape: f32[3,128,128], index: 5, kind: input, shape index: {}]   ;;  %s2452_s6 = inlined_call_operand.vmem [shape: f32[1,128], index: 6, kind: input, shape index: {}]   ;;  %s2453_s7 = inlined_call_operand.hbm [shape: f32[2,16,128], index: 7, kind: output, shape index: {}]  }
   0x1   :  { %14 = vsyncpa [#allocation3 + $0x1], 0 }
   0x2   :  { %15 = vsyncpa [#allocation6], 0 }
   0x3   :  { %16 = vsyncpa [#allocation9], 0 }
   0x4   :  { %17 = vsyncpa [#allocation4], 0 }
   0x5   :  { %19 = vsyncpa [#allocation4 + $0x1], 0  ;;  %s2045_s24 = smov 0   ;;  %s2047_s25 = smov 0  }
   0x6   :  { %s2049_s26 = smov 0   ;;  %s2051_s27 = smov 0  }
   0x7 LB: > { %s2066_s28 = sadd.s32 4294967295, %s1992_s27   ;;  %s1228_s29 = sadd.s32 4294967294, %s1992_s27   ;;  %s1992_s27 = sphi %s2051_s27, %s2479_s27   ;;  %s1988_s26 = sphi %s2049_s26, %s2478_s26   ;;  %s1984_s25 = sphi %s2047_s25, %s2477_s25   ;;  %s1980_s24 = sphi %s2045_s24, %s2476_s24  }
   0x8   : > { %p45_p0 = scmp.ne.s32.totalorder %s1984_s25, %s1980_s24  ;;  %p2454_p1 = scmp.eq.s32.totalorder %s2066_s28, 0 }
   0x9   : > { %p201_p3 = scmp.eq.s32.totalorder %s1228_s29, 1  ;;  %p1229_p5 = scmp.ge.s32.totalorder %s1992_s27, 1 }
   0xa   : > { %p2075_p4 = por %p2454_p1, %p45_p0  ;;  %p208_p7 = scmp.lt.s32.totalorder %s1992_s27, 3 }
   0xb   : > { %p2080_p6 = por %p201_p3, %p45_p0  ;;  %s1994_s10 = smov [#allocation5]  }
   0xc   : > { %s2458_s30 = scalar_select %p2075_p4, 1, 0 }
   0xd   : > { %s2459_s8 = scalar_select %p2080_p6, 1, 0 }
   0xe   : > { %p2085_p8 = pnand %p1229_p5, %p208_p7  ;;  %s220_s11 = sshll.u32 %s1994_s10, 4  ;;  %s2089_s11 = int_to_ptr.vmem [resolvable:$true] %s220_s11 }
   0xf   : > { %2460 = sst [smem:[#allocation16_spill]] %s2459_s8  ;;  %s1995_s13 = smov [#allocation8]  }
  0x10   : > { %s2461_s9 = scalar_select %p2085_p8, 1, 0 }
  0x11   : > { %p1684_p9 = pneg %p2085_p8  ;;  %s246_s14 = sshll.u32 %s1995_s13, 4  ;;  %s2100_s14 = int_to_ptr.vmem [resolvable:$true] %s246_s14 }
  0x12   : > { %s1996_s15 = smov [#allocation7]   ;;  %s1776_s19 = scalar_lea.hbm %s2447_s1, 256 }
  0x13   : > { %p2096_p11 = pnand %p1684_p9, %p2454_p1  ;;  %s2102_s16 = sshll.u32 %s1996_s15, 4  ;;  %s234_s16 = int_to_ptr.vmem [resolvable:$true] %s2102_s16 }
  0x14   : > { %p1777_p12 = scmp.ne.s32.totalorder %s2447_s1, %s1776_s19  ;;  %p1783_p5 = scmp.lt.u32.totalorder %s1776_s19, %s2447_s1 }
  0x15   : > { %p2112_p13 = pneg %p2096_p11 }
  0x17   : > { %p1779_p0 = pnand %p2112_p13, %p1777_p12 }
  0x19   : > { %p1780_p3 = pneg %p1779_p0 }
  0x1b   : > { %p1785_p7 = pnand %p1783_p5, %p1780_p3 }
  0x1d   : > { %1788 = shalt.err (!%p1785_p7)
}
  0x1e   : > { %s1789_s10 = scalar_lea.vmem %s2089_s11, 256  ;;  %p1797_p2 = scmp.lt.s32.totalorder %s2089_s11, %s2089_s11 }
  0x1f   : > { %p1790_p9 = scmp.ne.s32.totalorder %s2089_s11, %s1789_s10  ;;  %p1798_p6 = scmp.lt.s32.totalorder %s1789_s10, %s1789_s10 }
  0x21   : > { %p1792_p10 = pnand %p1790_p9, %p2112_p13  ;;  %p1799_p12 = por %p1798_p6, %p1797_p2 }
  0x23   : > { %p1793_p1 = pneg %p1792_p10 }
  0x25   : > { %p1800_p0 = pnand %p1799_p12, %p1793_p1 }
  0x27   : > { %1803 = shalt.err (!%p1800_p0)
}
  0x28   : > { %s1997_s13 = smov 128   ;;  %s1998_s15 = smov 8  }
  0x29   : > { %1687 = dma.hbm_to_vmem [thread:$0]  (!%p2096_p11), %s2447_s1, 256, %s2089_s11, [#allocation6], %s1997_s13, %s1997_s13, %s1998_s15  }
  0x2a   : > { %s1804_s21 = scalar_lea.hbm %s2449_s3, 3072 }
  0x2b   : > { %p1805_p1 = scmp.ne.s32.totalorder %s2449_s3, %s1804_s21  ;;  %p1811_p10 = scmp.lt.u32.totalorder %s1804_s21, %s2449_s3 }
  0x2d   : > { %p1807_p2 = pnand %p1805_p1, %p2112_p13 }
  0x2f   : > { %p1808_p6 = pneg %p1807_p2 }
  0x31   : > { %p1813_p3 = pnand %p1811_p10, %p1808_p6 }
  0x33   : > { %1816 = shalt.err (!%p1813_p3)
}
  0x34   : > { %s1817_s11 = scalar_lea.vmem %s2100_s14, 3072  ;;  %p1825_p12 = scmp.lt.s32.totalorder %s2100_s14, %s2100_s14 }
  0x35   : > { %p1818_p5 = scmp.ne.s32.totalorder %s2100_s14, %s1817_s11  ;;  %p1826_p0 = scmp.lt.s32.totalorder %s1817_s11, %s1817_s11 }
  0x37   : > { %p1820_p7 = pnand %p1818_p5, %p2112_p13  ;;  %p1827_p1 = por %p1826_p0, %p1825_p12 }
  0x39   : > { %p1821_p9 = pneg %p1820_p7 }
  0x3b   : > { %p1828_p2 = pnand %p1827_p1, %p1821_p9 }
  0x3d   : > { %1831 = shalt.err (!%p1828_p2)
}
  0x3e   : > { %1693 = dma.hbm_to_vmem [thread:$0]  (!%p2096_p11), %s2449_s3, 3072, %s2100_s14, [#allocation9], %s1997_s13, %s1997_s13, %s1998_s15  }
  0x3f   : > { %s1832_s20 = scalar_lea.hbm %s2448_s2, 256 }
  0x40   : > { %p1833_p6 = scmp.ne.s32.totalorder %s2448_s2, %s1832_s20  ;;  %p1839_p5 = scmp.lt.u32.totalorder %s1832_s20, %s2448_s2 }
  0x42   : > { %p1835_p10 = pnand %p1833_p6, %p2112_p13 }
  0x44   : > { %p1836_p3 = pneg %p1835_p10 }
  0x46   : > { %p1841_p7 = pnand %p1839_p5, %p1836_p3 }
  0x48   : > { %1844 = shalt.err (!%p1841_p7)
}
  0x49   : > { %s1845_s11 = scalar_lea.vmem %s234_s16, 256  ;;  %p1853_p1 = scmp.lt.s32.totalorder %s234_s16, %s234_s16 }
  0x4a   : > { %p1846_p9 = scmp.ne.s32.totalorder %s234_s16, %s1845_s11  ;;  %p1854_p2 = scmp.lt.s32.totalorder %s1845_s11, %s1845_s11 }
  0x4c   : > { %p1848_p12 = pnand %p1846_p9, %p2112_p13  ;;  %p1855_p4 = por %p1854_p2, %p1853_p1 }
  0x4e   : > { %p1849_p0 = pneg %p1848_p12 }
  0x50   : > { %p1856_p8 = pnand %p1855_p4, %p1849_p0 }
  0x52   : > { %1859 = shalt.err (!%p1856_p8)
}
  0x53   : > { %1690 = dma.hbm_to_vmem [thread:$0]  (!%p2096_p11), %s2448_s2, 256, %s234_s16, [#allocation6], %s1997_s13, %s1997_s13, %s1998_s15  }
  0x54   : > { %s1999_s17 = smov [#allocation10]   ;;  %s1860_s21 = scalar_lea.hbm %s2451_s5, 6144 }
  0x55   : > { %s262_s18 = sshll.u32 %s1999_s17, 4  ;;  %p1861_p4 = scmp.ne.s32.totalorder %s2451_s5, %s1860_s21  ;;  %s263_s18 = int_to_ptr.vmem [resolvable:$true] %s262_s18 }
  0x56   : > { %p1867_p10 = scmp.lt.u32.totalorder %s1860_s21, %s2451_s5 }
  0x57   : > { %p1863_p8 = pnand %p1861_p4, %p2112_p13 }
  0x59   : > { %p1864_p6 = pneg %p1863_p8 }
  0x5b   : > { %p1869_p3 = pnand %p1867_p10, %p1864_p6 }
  0x5d   : > { %1872 = shalt.err (!%p1869_p3)
}
  0x5e   : > { %s1873_s16 = scalar_lea.vmem %s263_s18, 6144  ;;  %p1881_p12 = scmp.lt.s32.totalorder %s263_s18, %s263_s18 }
  0x5f   : > { %p1874_p5 = scmp.ne.s32.totalorder %s263_s18, %s1873_s16  ;;  %p1882_p0 = scmp.lt.s32.totalorder %s1873_s16, %s1873_s16 }
  0x61   : > { %p1876_p7 = pnand %p1874_p5, %p2112_p13  ;;  %p1883_p1 = por %p1882_p0, %p1881_p12 }
  0x63   : > { %p1877_p9 = pneg %p1876_p7 }
  0x65   : > { %p1884_p2 = pnand %p1883_p1, %p1877_p9 }
  0x67   : > { %1887 = shalt.err (!%p1884_p2)
}
  0x68   : > { %1696 = dma.hbm_to_vmem [thread:$0]  (!%p2096_p11), %s2451_s5, 6144, %s263_s18, [#allocation9], %s1997_s13, %s1997_s13, %s1998_s15  }
  0x69   : > { %s2206_s22 = sadd.s32 1, %s1992_s27   ;;  %s32_s12 = sadd.s32 1, %s1988_s26 }
  0x6a   : > { %s29_s17 = ssub.s32 %s1992_s27, %s2206_s22  ;;  %p39_p13 = scmp.ne.s32.totalorder %s1988_s26, %s1984_s25 }
  0x6b   : > { %p30_p4 = scmp.eq.s32.totalorder %s29_s17, 0  ;;  %p40_p8 = scmp.eq.s32.totalorder %s1992_s27, 0 }
  0x6c   : > { %p2464_p6 = scmp.eq.s32.totalorder %s2066_s28, 1  ;;  %p1709_p3 = scmp.lt.s32.totalorder %s1992_s27, 2 }
  0x6d   : > { %s2222_s20 = scalar_select %p30_p4, %s1988_s26, %s32_s12  }
  0x6e   : > { %p2216_p10 = por %p2464_p6, %p39_p13  ;;  %p41_p5 = por %p40_p8, %p39_p13 }
  0x6f   : > { %s279_s21 = sand.u32 1, %s1988_s26   ;;  %s1264_s18 = sshll.u32 %s1992_s27, 8 }
  0x70   : > { %s1235_s23 = sshll.u32 %s279_s21, 4  ;;  %s2229_s11 = scalar_lea.hbm %s2446_s0, %s1264_s18 }
  0x71   : > { %s283_s16 = scalar_lea.vmem [#allocation2], %s1235_s23  ;;  %p2233_p11 = pnand %p1709_p3, %p41_p5 }
  0x72   : > { %s290_s14 = sshll.u32 %s283_s16, 4  ;;  %s2237_s12 = scalar_lea.sflag [#allocation3], %s279_s21  ;;  %s2231_s14 = int_to_ptr.vmem [resolvable:$true] %s290_s14 }
  0x73   : > { %s1888_s17 = scalar_lea.hbm %s2229_s11, 256  ;;  %p1890_p9 = pneg %p2233_p11 }
  0x74   : > { %p1889_p7 = scmp.ne.s32.totalorder %s2229_s11, %s1888_s17  ;;  %s1893_s29 = scalar_lea.hbm %s2446_s0, 512 }
  0x75   : > { %p1894_p1 = scmp.lt.u32.totalorder %s2229_s11, %s2446_s0  ;;  %p1895_p2 = scmp.lt.u32.totalorder %s1893_s29, %s1888_s17 }
  0x76   : > { %p1891_p12 = pnand %p1890_p9, %p1889_p7  ;;  %p1897_p4 = scmp.lt.u32.totalorder %s1888_s17, %s2229_s11 }
  0x77   : > { %p1896_p13 = por %p1895_p2, %p1894_p1 }
  0x78   : > { %p1892_p0 = pneg %p1891_p12 }
  0x79   : > { %p1898_p8 = por %p1897_p4, %p1896_p13 }
  0x7b   : > { %p1899_p6 = pnand %p1898_p8, %p1892_p0 }
  0x7d   : > { %1902 = shalt.err (!%p1899_p6)
}
  0x7e   : > { %s1903_s21 = scalar_lea.vmem %s2231_s14, 256  ;;  %s2000_s23 = smov [#allocation2]  }
  0x7f   : > { %p1904_p3 = scmp.ne.s32.totalorder %s2231_s14, %s1903_s21  ;;  %s1908_s18 = sshll.u32 %s2000_s23, 4  ;;  %s1909_s18 = int_to_ptr.vmem [resolvable:$false] %s1908_s18 }
  0x80   : > { %s1910_s10 = scalar_lea.vmem %s1909_s18, 512  ;;  %p1911_p12 = scmp.lt.s32.totalorder %s2231_s14, %s1909_s18 }
  0x81   : > { %p1906_p5 = pnand %p1904_p3, %p1890_p9  ;;  %p1912_p1 = scmp.lt.s32.totalorder %s1910_s10, %s1903_s21 }
  0x83   : > { %p1907_p7 = pneg %p1906_p5  ;;  %p1913_p2 = por %p1912_p1, %p1911_p12 }
  0x85   : > { %p1914_p13 = pnand %p1913_p2, %p1907_p7 }
  0x87   : > { %1917 = shalt.err (!%p1914_p13)
}
  0x88   : > { %1700 = dma.hbm_to_vmem [thread:$0]  (!%p2233_p11), %s2229_s11, 256, %s2231_s14, %s2237_s12, %s1997_s13, %s1997_s13, %s1998_s15  }
  0x89   : > { %p2467_p9 = scmp.ne.s32.totalorder %s2461_s9, 0 }
  0x8a   : > { %s2271_s17 = sand.u32 (!%p2467_p9), 1, %s1984_s25   ;;  %p2468_p0 = scmp.ne.s32.totalorder (!%p2467_p9), %s2458_s30, 0 }
  0x8b   : > { %302 = sbr.rel (%p2467_p9) target bundleno = 1079 (0x437), region = 48  ;;  %s1239_s29 = sshll.u32 (!%p2467_p9), %s2271_s17, 4 }
  0x8c   : > { %s305_s16 = scalar_lea.sflag (!%p2467_p9), [#allocation3], %s2271_s17  ;;  %s308_s8 = scalar_lea.vmem (!%p2467_p9), [#allocation2], %s1239_s29 }
  0x92   : > { %1963 = dma.done.wait (%p2468_p0), %s305_s16, 256  }
  0x93   : > { %1965 = vsyncadd (%p2468_p0), %s305_s16, 4294967040  ;;  %p2469_p11 = scmp.eq.s32.totalorder %s2066_s28, 0 }
  0x95   : > { %1967 = dma.done.wait (%p2469_p11), [#allocation6], 512   ;;  %p2470_p4 = pmov %p2469_p11 }
  0x97   : > { %1969 = vsyncadd (%p2470_p4), [#allocation6], 4294966784  ;;  %p2471_p8 = pmov %p2470_p4 }
  0x98   : > { %p2472_p6 = pmov %p2470_p4 }
  0x99   : > { %1971 = dma.done.wait (%p2471_p8), [#allocation9], 9216  }
  0x9a   : > { %1973 = vsyncadd (%p2472_p6), [#allocation9], 4294958080  ;;  %vm357_vm0 = vcmask 523264   ;;  %v355_v0 = vld [vmem:[%s308_s8] sm:$0xff]  ;;  %v356_v1 = vld [vmem:[%s308_s8 + $0x8] sm:$0xff]  ;;  %v402_v4 = vlaneseq  ;;  %v2001_v5 = vmov 0  }
  0x9b   : > { %v358_v2 = vsel %vm357_vm0, %v355_v0, 0.0  ;;  %v361_v3 = vsel %vm357_vm0, %v356_v1, 0.0  ;;  %1757 = vset.pattern.permute.xlu1 %v2001_v5  ;;  %1756 = vset.pattern.permute.xlu0 %v2001_v5  ;;  %v496_v44 = vld [vmem:[#allocation8 + $0x40] sm:$0xff]  ;;  %v497_v45 = vld [vmem:[#allocation8 + $0x48] sm:$0xff]  ;;  %v498_v47 = vld [vmem:[#allocation8 + $0x50] sm:$0xff]  ;;  %s354_s11 = scalar_lea.vmem [#allocation11], %s1239_s29 }
  0x9c   : > { %359 = vadd.xlane.f32.xlu0 %v358_v2  ;;  %v2291_v6 = vshrl.u32 %v402_v4, 7  ;;  %v1512_v46 = vpack.c.bf16 %v497_v45, %v496_v44  ;;  %v499_v48 = vld [vmem:[#allocation8 + $0x58] sm:$0xff]  ;;  %v500_v50 = vld [vmem:[#allocation8 + $0x60] sm:$0xff]  ;;  %v501_v51 = vld [vmem:[#allocation8 + $0x68] sm:$0xff]  ;;  %s1117_s14 = sshll.u32 %s354_s11, 4  ;;  %s1265_s12 = sshll.u32 %s2066_s28, 8  ;;  %s2397_s14 = int_to_ptr.vmem [resolvable:$true] %s1117_s14 }
  0x9d   : > { %v1516_v49 = vpack.c.bf16 %v499_v48, %v498_v47  ;;  %v1520_v52 = vpack.c.bf16 %v501_v51, %v500_v50  ;;  %v502_v53 = vld [vmem:[#allocation8 + $0x70] sm:$0xff]  ;;  %v503_v54 = vld [vmem:[#allocation8 + $0x78] sm:$0xff]  ;;  %v487_v56 = vld [vmem:[#allocation8] sm:$0xff]  ;;  %s2402_s18 = scalar_lea.hbm %s2453_s7, %s1265_s12  ;;  %s1104_s10 = scalar_lea.sflag [#allocation4], %s2271_s17 }
  0x9e   : > { %v404_v7 = vadd.s32 8, %v2291_v6  ;;  %v410_v8 = vrot.slane %v2291_v6, 1  ;;  %vm412_vm1 = vcmp.lt.s32.totalorder %v2291_v6, 7  ;;  %v1245_v9 = vadd.s32 4294967295, %v2291_v6  ;;  %1513 = vmatprep.subr.bf16.mxu0 %v1512_v46  ;;  %v488_v57 = vld [vmem:[#allocation8 + $0x8] sm:$0xff]  ;;  %v508_v50 = vld [vmem:[#allocation8 + $0x98] sm:$0xff] }
  0x9f   : > { %v405_v13 = vrot.slane %v2291_v6, 7  ;;  %vm407_vm3 = vcmp.lt.s32.totalorder %v2291_v6, 1  ;;  %v421_v21 = vadd.s32 1, %v2291_v6  ;;  %1515 = vmatpush3.bf16.msra.mxu0 %v1512_v46  ;;  %v1524_v55 = vpack.c.bf16 %v503_v54, %v502_v53  ;;  %s1918_s29 = scalar_lea.vmem %s2397_s14, 256  ;;  %s2002_s28 = smov [#allocation11]  }
  0xa0   : > { %362 = vadd.xlane.f32.xlu0 %v361_v3  ;;  %v411_v10 = vrot.slane %v404_v7, 1  ;;  %v406_v14 = vrot.slane %v404_v7, 7  ;;  %v1246_v15 = vadd.s32 4294967295, %v404_v7  ;;  %v422_v24 = vadd.s32 1, %v404_v7  ;;  %1517 = vmatprep.subr.bf16.mxu0 %v1516_v49  ;;  %p1919_p3 = scmp.ne.s32.totalorder %s2397_s14, %s1918_s29  ;;  %s1922_s16 = sshll.u32 %s2002_s28, 4  ;;  %s1923_s16 = int_to_ptr.vmem [resolvable:$false] %s1922_s16 }
  0xa1   : > { %v1528_v58 = vpack.c.bf16 %v488_v57, %v487_v56  ;;  %v509_v57 = vld [vmem:[#allocation8 + $0xa0] sm:$0xff]  ;;  %s1924_s8 = scalar_lea.vmem %s1923_s16, 512  ;;  %p1925_p12 = scmp.lt.s32.totalorder %s2397_s14, %s1923_s16 }
  0xa2   : > { %v413_v11 = vsel %vm412_vm1, %v410_v8, %v411_v10  ;;  %v408_v16 = vsel %vm407_vm3, %v405_v13, %v406_v14  ;;  %v414_v18 = vsel %vm412_vm1, %v411_v10, %v410_v8  ;;  %v409_v20 = vsel %vm407_vm3, %v406_v14, %v405_v13  ;;  %v394_v10 = vld [vmem:[#allocation5] sm:$0xff]  ;;  %v398_v14 = vld [vmem:[#allocation7] sm:$0xff]  ;;  %p1920_p5 = pnand %p1919_p3, %p2216_p10  ;;  %p1926_p1 = scmp.lt.s32.totalorder %s1924_s8, %s1918_s29 }
  0xa3   : > { %vm419_vm2 = vcmp.eq.s32.totalorder %v413_v11, %v1245_v9  ;;  %vm418_vm4 = vcmp.eq.s32.totalorder %v408_v16, %v1246_v15  ;;  %vm420_vm5 = vcmp.eq.s32.totalorder %v414_v18, %v1246_v15  ;;  %vm423_vm6 = vcmp.eq.s32.totalorder %v409_v20, %v421_v21  ;;  %1519 = vmatpush3.bf16.msra.mxu0 %v1516_v49  ;;  %v399_v15 = vld [vmem:[#allocation7 + $0x8] sm:$0xff]  ;;  %v507_v49 = vld [vmem:[#allocation8 + $0x90] sm:$0xff] }
  0xa4   : > { %v447_v12 = vsel %vm419_vm2, 1, %v2001_v5  ;;  %v436_v17 = vsel %vm418_vm4, 1, %v2001_v5  ;;  %v448_v19 = vsel %vm420_vm5, 1, %v2001_v5  ;;  %v461_v22 = vsel %vm423_vm6, 1, %v2001_v5  ;;  %1521 = vmatprep.subr.bf16.mxu0 %v1520_v52  ;;  %p1921_p7 = pneg %p1920_p5  ;;  %p1927_p2 = por %p1926_p1, %p1925_p12 }
  0xa5   : > { %vm425_vm7 = vcmp.eq.s32.totalorder %v413_v11, %v421_v21  ;;  %vm424_vm8 = vcmp.eq.s32.totalorder %v408_v16, %v422_v24  ;;  %vm417_vm9 = vcmp.eq.s32.totalorder %v409_v20, %v1245_v9  ;;  %vm426_vm10 = vcmp.eq.s32.totalorder %v414_v18, %v422_v24  ;;  %v395_v11 = vld [vmem:[#allocation5 + $0x8] sm:$0xff]  ;;  %v489_v18 = vld [vmem:[#allocation8 + $0x10] sm:$0xff] }
  0xa6   : > { %v473_v23 = vsel %vm425_vm7, 1, %v2001_v5  ;;  %v462_v25 = vsel %vm424_vm8, 1, %v2001_v5  ;;  %v435_v26 = vsel %vm417_vm9, 1, %v2001_v5  ;;  %v474_v27 = vsel %vm426_vm10, 1, %v2001_v5  ;;  %p1928_p13 = pnand %p1927_p2, %p1921_p7 }
  0xa7   : > { %1523 = vmatpush3.bf16.msra.mxu0 %v1520_v52  ;;  %v1548_v54 = vpack.c.bf16 %v508_v50, %v507_v49  ;;  %v832_v49 = vld [vmem:[#allocation10 + $0xf0] sm:$0xff]  ;;  %v833_v50 = vld [vmem:[#allocation10 + $0xf8] sm:$0xff] }
  0xa8   : > { %1525 = vmatprep.subr.bf16.mxu0 %v1524_v55 }
  0xab   : > { %1527 = vmatpush3.bf16.msra.mxu0 %v1524_v55 }
  0xac   : > { %1529 = vmatprep.subr.bf16.mxu0 %v1528_v58 }
  0xb6   : > { %438 = vperm.xlu0 %1756, %v435_v26  }
 0x129   : > { %v360_v28 = vpop.xlane.xlu0 %359 }
 0x12d   : > { %v363_v29 = vpop.xlane.xlu0 %362 }
 0x12e   : > { %v364_v30 = vadd.f32 %v363_v29, %v360_v28  ;;  %v491_v29 = vld [vmem:[#allocation8 + $0x20] sm:$0xff] }
 0x130   : > { %v365_v31 = vrot.slane %v364_v30, 4 }
 0x132   : > { %v366_v32 = vadd.f32 %v365_v31, %v364_v30  ;;  %v492_v30 = vld [vmem:[#allocation8 + $0x28] sm:$0xff] }
 0x134   : > { %v367_v33 = vrot.slane %v366_v32, 2 }
 0x136   : > { %v368_v34 = vadd.f32 %v367_v33, %v366_v32 }
 0x138   : > { %v369_v35 = vrot.slane %v368_v34, 1 }
 0x13a   : > { %v370_v36 = vadd.f32 %v369_v35, %v368_v34  ;;  %v1536_v35 = vpack.c.bf16 %v492_v30, %v491_v29  ;;  %v826_v29 = vld [vmem:[#allocation10 + $0xc0] sm:$0xff]  ;;  %v827_v30 = vld [vmem:[#allocation10 + $0xc8] sm:$0xff] }
 0x13c   : > { %v371_v37 = vmul.f32 0.0009765625, %v370_v36  ;;  %v493_v36 = vld [vmem:[#allocation8 + $0x30] sm:$0xff] }
 0x13e   : > { %v372_v38 = vsub.f32 %v355_v0, %v371_v37  ;;  %v373_v39 = vsub.f32 %v356_v1, %v371_v37  ;;  %v494_v37 = vld [vmem:[#allocation8 + $0x38] sm:$0xff] }
 0x140   : > { %v374_v40 = vmul.f32 %v372_v38, %v372_v38  ;;  %v375_v42 = vmul.f32 %v373_v39, %v373_v39 }
 0x142   : > { %v376_v41 = vsel %vm357_vm0, %v374_v40, 0.0  ;;  %v379_v43 = vsel %vm357_vm0, %v375_v42, 0.0  ;;  %v1540_v40 = vpack.c.bf16 %v494_v37, %v493_v36  ;;  %v506_v42 = vld [vmem:[#allocation8 + $0x88] sm:$0xff]  ;;  %v828_v36 = vld [vmem:[#allocation10 + $0xd0] sm:$0xff]  ;;  %v829_v37 = vld [vmem:[#allocation10 + $0xd8] sm:$0xff] }
 0x143   : > { %377 = vadd.xlane.f32.xlu1 %v376_v41  ;;  %v505_v41 = vld [vmem:[#allocation8 + $0x80] sm:$0xff] }
 0x144   : > { %v1544_v46 = vpack.c.bf16 %v506_v42, %v505_v41  ;;  %v830_v42 = vld [vmem:[#allocation10 + $0xe0] sm:$0xff] }
 0x147   : > { %380 = vadd.xlane.f32.xlu1 %v379_v43 }
 0x158   : > { %450 = vperm.xlu1 %1757, %v447_v12  }
 0x15c   : > { %441 = vperm.xlu1 %1757, %v436_v17  }
 0x160   : > { %453 = vperm.xlu1 %1757, %v448_v19   ;;  %v490_v19 = vld [vmem:[#allocation8 + $0x18] sm:$0xff] }
 0x161   : > { %v1532_v24 = vpack.c.bf16 %v490_v19, %v489_v18  ;;  %v803_v18 = vld [vmem:[#allocation10 + $0x10] sm:$0xff]  ;;  %v804_v19 = vld [vmem:[#allocation10 + $0x18] sm:$0xff] }
 0x164   : > { %464 = vperm.xlu1 %1757, %v461_v22  }
 0x168   : > { %476 = vperm.xlu1 %1757, %v473_v23   ;;  %v2317_v23 = vpop.permute.xlu0 %438 }
 0x169   : > { %vm443_vm12 = vcmp.eq.s32.totalorder %v2317_v23, 1 }
 0x16c   : > { %467 = vperm.xlu1 %1757, %v462_v25  }
 0x170   : > { %479 = vperm.xlu1 %1757, %v474_v27  }
 0x1d0   : > { %v378_v59 = vpop.xlane.xlu1 %377 }
 0x1d4   : > { %v381_v60 = vpop.xlane.xlu1 %380 }
 0x1d5   : > { %v382_v61 = vadd.f32 %v381_v60, %v378_v59  ;;  %v511_v60 = vld [vmem:[#allocation8 + $0xb0] sm:$0xff] }
 0x1d7   : > { %v383_v62 = vrot.slane %v382_v61, 4 }
 0x1d8   : > { %v2310_v7 = vpop.permute.xlu1 %450 }
 0x1d9   : > { %v384_v63 = vadd.f32 %v383_v62, %v382_v61  ;;  %vm455_vm11 = vcmp.eq.s32.totalorder %v2310_v7, 1  ;;  %v512_v61 = vld [vmem:[#allocation8 + $0xb8] sm:$0xff] }
 0x1db   : > { %v385_v0 = vrot.slane %v384_v63, 2 }
 0x1dc   : > { %v2312_v8 = vpop.permute.xlu1 %441 }
 0x1dd   : > { %v386_v1 = vadd.f32 %v385_v0, %v384_v63  ;;  %vm444_vm13 = vcmp.eq.s32.totalorder %v2312_v8, 1  ;;  %v1556_v63 = vpack.c.bf16 %v512_v61, %v511_v60  ;;  %v836_v60 = vld [vmem:[#allocation10 + $0x108] sm:$0xff] }
 0x1df   : > { %v387_v2 = vrot.slane %v386_v1, 1 }
 0x1e0   : > { %v2314_v20 = vpop.permute.xlu1 %453 }
 0x1e1   : > { %v388_v3 = vadd.f32 %v387_v2, %v386_v1  ;;  %vm456_vm14 = vcmp.eq.s32.totalorder %v2314_v20, 1  ;;  %v841_v20 = vld [vmem:[#allocation10 + $0x130] sm:$0xff] }
 0x1e3   : > { %v389_v4 = vmul.f32 0.0009765625, %v388_v3  ;;  %v818_v3 = vld [vmem:[#allocation10 + $0x80] sm:$0xff] }
 0x1e4   : > { %v2328_v34 = vpop.permute.xlu1 %464 }
 0x1e5   : > { %v390_v5 = vadd.f32 1e-05, %v389_v4  ;;  %vm469_vm15 = vcmp.eq.s32.totalorder %v2328_v34, 1  ;;  %v819_v4 = vld [vmem:[#allocation10 + $0x88] sm:$0xff] }
 0x1e7   : > { %1758 = vrsqrt.f32 %v390_v5  ;;  %v1560_v5 = vpack.c.bf16 %v819_v4, %v818_v3 }
 0x1e8   : > { %v2339_v45 = vpop.permute.xlu1 %476 }
 0x1e9   : > { %vm481_vm2 = vcmp.eq.s32.totalorder %v2339_v45, 1  ;;  %v840_v45 = vld [vmem:[#allocation10 + $0x128] sm:$0xff] }
 0x1ec   : > { %v2351_v56 = vpop.permute.xlu1 %467 }
 0x1ed   : > { %vm470_vm4 = vcmp.eq.s32.totalorder %v2351_v56, 1 }
 0x1f0   : > { %v2355_v62 = vpop.permute.xlu1 %479 }
 0x1f1   : > { %v1759_v9 = vpop.eup %1758  ;;  %vm482_vm5 = vcmp.eq.s32.totalorder %v2355_v62, 1 }
 0x1f2   : > { %v392_v12 = vmul.f32 %v1759_v9, %v372_v38  ;;  %v393_v13 = vmul.f32 %v1759_v9, %v373_v39  ;;  %v820_v9 = vld [vmem:[#allocation10 + $0x90] sm:$0xff] }
 0x1f4   : > { %v396_v16 = vmul.f32 %v394_v10, %v392_v12  ;;  %v397_v17 = vmul.f32 %v395_v11, %v393_v13  ;;  %v821_v10 = vld [vmem:[#allocation10 + $0x98] sm:$0xff]  ;;  %v801_v12 = vld [vmem:[#allocation10] sm:$0xff]  ;;  %v802_v13 = vld [vmem:[#allocation10 + $0x8] sm:$0xff] }
 0x1f5   : > { %v1564_v11 = vpack.c.bf16 %v821_v10, %v820_v9 }
 0x1f6   : > { %v400_v21 = vadd.f32 %v398_v14, %v396_v16  ;;  %v401_v22 = vadd.f32 %v399_v15, %v397_v17  ;;  %v1592_v14 = vpack.c.bf16 %v802_v13, %v801_v12  ;;  %v822_v15 = vld [vmem:[#allocation10 + $0xa0] sm:$0xff]  ;;  %v823_v16 = vld [vmem:[#allocation10 + $0xa8] sm:$0xff] }
 0x1f7   : > { %v1568_v17 = vpack.c.bf16 %v823_v16, %v822_v15 }
 0x1f8   : > { %v431_v25 = vrot.slane %v400_v21, 1  ;;  %v432_v26 = vrot.slane %v401_v22, 1  ;;  %v427_v27 = vrot.slane %v400_v21, 7  ;;  %v428_v28 = vrot.slane %v401_v22, 7  ;;  %1366 = vmatprep.mubr.msk.f32.mxu0 %vm357_vm0, %v400_v21  ;;  %1593 = vmatprep.subr.bf16.mxu1 %v1592_v14 }
 0x1f9   : > { %1367 = vmatmul.mubr.msk.f32.vlgmr.msra.gmra.mrb[0].mxu0 %vm357_vm0, %v401_v22  ;;  %1595 = vmatpush3.bf16.msra.mxu1 %v1592_v14  ;;  %v1596_v21 = vpack.c.bf16 %v804_v19, %v803_v18  ;;  %v824_v22 = vld [vmem:[#allocation10 + $0xb0] sm:$0xff] }
 0x1fa   : > { %v433_v31 = vsel %vm412_vm1, %v431_v25, %v432_v26  ;;  %v430_v32 = vsel %vm407_vm3, %v428_v28, %v427_v27  ;;  %1531 = vmatpush3.bf16.msra.mxu0 %v1528_v58  ;;  %v429_v43 = vsel %vm407_vm3, %v427_v27, %v428_v28  ;;  %v434_v44 = vsel %vm412_vm1, %v432_v26, %v431_v25  ;;  %v510_v58 = vld [vmem:[#allocation8 + $0xa8] sm:$0xff]  ;;  %v805_v26 = vld [vmem:[#allocation10 + $0x20] sm:$0xff] }
 0x1fb   : > { %v457_v33 = vsel %vm455_vm11, %v433_v31, 0.0  ;;  %1533 = vmatprep.subr.bf16.mxu0 %v1532_v24  ;;  %v445_v38 = vsel %vm443_vm12, %v430_v32, 0.0  ;;  %v446_v47 = vsel %vm444_vm13, %v429_v43, 0.0  ;;  %v458_v48 = vsel %vm456_vm14, %v434_v44, 0.0  ;;  %1597 = vmatprep.subr.bf16.mxu1 %v1596_v21  ;;  %v806_v27 = vld [vmem:[#allocation10 + $0x28] sm:$0xff] }
 0x1fc   : > { %v459_v39 = vadd.f32 %v457_v33, %v445_v38  ;;  %v471_v51 = vsel %vm469_vm15, %v430_v32, 0.0  ;;  %v483_v52 = vsel %vm481_vm2, %v433_v31, 0.0  ;;  %v460_v53 = vadd.f32 %v458_v48, %v446_v47  ;;  %v807_v32 = vld [vmem:[#allocation10 + $0x30] sm:$0xff]  ;;  %v808_v33 = vld [vmem:[#allocation10 + $0x38] sm:$0xff] }
 0x1fd   : > { %v485_v55 = vadd.f32 %v483_v52, %v471_v51  ;;  %v1552_v59 = vpack.c.bf16 %v510_v58, %v509_v57  ;;  %v472_v0 = vsel %vm470_vm4, %v429_v43, 0.0  ;;  %v484_v1 = vsel %vm482_vm5, %v434_v44, 0.0  ;;  %1599 = vmatpush3.bf16.msra.mxu1 %v1596_v21  ;;  %v831_v43 = vld [vmem:[#allocation10 + $0xe8] sm:$0xff]  ;;  %v812_v47 = vld [vmem:[#allocation10 + $0x58] sm:$0xff]  ;;  %v813_v52 = vld [vmem:[#allocation10 + $0x60] sm:$0xff] }
 0x1fe   : > { %1535 = vmatpush3.bf16.msra.mxu0 %v1532_v24  ;;  %1385 = vmatprep.mubr.msk.f32.mxu0 %vm357_vm0, %v459_v39  ;;  %v486_v2 = vadd.f32 %v484_v1, %v472_v0  ;;  %v825_v24 = vld [vmem:[#allocation10 + $0xb8] sm:$0xff]  ;;  %v1600_v28 = vpack.c.bf16 %v806_v27, %v805_v26  ;;  %v1576_v31 = vpack.c.bf16 %v827_v30, %v826_v29  ;;  %v809_v39 = vld [vmem:[#allocation10 + $0x40] sm:$0xff]  ;;  %v837_v27 = vld [vmem:[#allocation10 + $0x110] sm:$0xff] }
 0x1ff   : > { %1537 = vmatprep.subr.bf16.mxu0 %v1536_v35  ;;  %v1572_v25 = vpack.c.bf16 %v825_v24, %v824_v22  ;;  %v1580_v38 = vpack.c.bf16 %v829_v37, %v828_v36  ;;  %v1584_v44 = vpack.c.bf16 %v831_v43, %v830_v42  ;;  %v1588_v51 = vpack.c.bf16 %v833_v50, %v832_v49  ;;  %v816_v57 = vld [vmem:[#allocation10 + $0x78] sm:$0xff]  ;;  %v844_v42 = vld [vmem:[#allocation10 + $0x148] sm:$0xff]  ;;  %v845_v43 = vld [vmem:[#allocation10 + $0x150] sm:$0xff] }
 0x200   : > { %1601 = vmatprep.subr.bf16.mxu1 %v1600_v28  ;;  %v849_v50 = vld [vmem:[#allocation10 + $0x170] sm:$0xff] }
 0x201   : > { %1603 = vmatpush3.bf16.msra.mxu1 %v1600_v28  ;;  %v838_v28 = vld [vmem:[#allocation10 + $0x118] sm:$0xff] }
 0x202   : > { %1539 = vmatpush3.bf16.msra.mxu0 %v1536_v35  ;;  %v1604_v35 = vpack.c.bf16 %v808_v33, %v807_v32  ;;  %v1628_v34 = vpack.c.bf16 %v838_v28, %v837_v27 }
 0x203   : > { %1541 = vmatprep.subr.bf16.mxu0 %v1540_v40 }
 0x204   : > { %1605 = vmatprep.subr.bf16.mxu1 %v1604_v35 }
 0x205   : > { %1607 = vmatpush3.bf16.msra.mxu1 %v1604_v35 }
 0x206   : > { %1543 = vmatpush3.bf16.msra.mxu0 %v1540_v40  ;;  %v810_v40 = vld [vmem:[#allocation10 + $0x48] sm:$0xff] }
 0x207   : > { %1545 = vmatprep.subr.bf16.mxu0 %v1544_v46  ;;  %v1608_v41 = vpack.c.bf16 %v810_v40, %v809_v39  ;;  %v842_v40 = vld [vmem:[#allocation10 + $0x138] sm:$0xff] }
 0x208   : > { %v1636_v56 = vpack.c.bf16 %v842_v40, %v841_v20 }
 0x209   : > { %1386 = vmatmul.mubr.msk.f32.vlgmr.msra.gmra.mrb[0].mxu0 %vm357_vm0, %v460_v53  ;;  %1609 = vmatprep.subr.bf16.mxu1 %v1608_v41  ;;  %v814_v53 = vld [vmem:[#allocation10 + $0x68] sm:$0xff] }
 0x20a   : > { %1547 = vmatpush3.bf16.msra.mxu0 %v1544_v46  ;;  %1404 = vmatprep.mubr.msk.f32.mxu0 %vm357_vm0, %v485_v55  ;;  %v811_v46 = vld [vmem:[#allocation10 + $0x50] sm:$0xff] }
 0x20b   : > { %1549 = vmatprep.subr.bf16.mxu0 %v1548_v54  ;;  %1611 = vmatpush3.bf16.msra.mxu1 %v1608_v41  ;;  %v1612_v48 = vpack.c.bf16 %v812_v47, %v811_v46  ;;  %v815_v55 = vld [vmem:[#allocation10 + $0x70] sm:$0xff]  ;;  %v843_v41 = vld [vmem:[#allocation10 + $0x140] sm:$0xff] }
 0x20c   : > { %v1620_v58 = vpack.c.bf16 %v816_v57, %v815_v55  ;;  %v1640_v62 = vpack.c.bf16 %v844_v42, %v843_v41  ;;  %v847_v47 = vld [vmem:[#allocation10 + $0x160] sm:$0xff] }
 0x20d   : > { %1613 = vmatprep.subr.bf16.mxu1 %v1612_v48  ;;  %v1256_v57 = vld [vmem:[%s2452_s6] ss:$0 sm:$0xff] }
 0x20e   : > { %1551 = vmatpush3.bf16.msra.mxu0 %v1548_v54  ;;  %v1616_v54 = vpack.c.bf16 %v814_v53, %v813_v52 }
 0x20f   : > { %1553 = vmatprep.subr.bf16.mxu0 %v1552_v59  ;;  %1615 = vmatpush3.bf16.msra.mxu1 %v1612_v48  ;;  %v848_v48 = vld [vmem:[#allocation10 + $0x168] sm:$0xff] }
 0x210   : > { %1617 = vmatprep.subr.bf16.mxu1 %v1616_v54  ;;  %v1648_v49 = vpack.c.bf16 %v848_v48, %v847_v47 }
 0x212   : > { %1555 = vmatpush3.bf16.msra.mxu0 %v1552_v59  ;;  %v835_v59 = vld [vmem:[#allocation10 + $0x100] sm:$0xff] }
 0x213   : > { %1557 = vmatprep.subr.bf16.mxu0 %v1556_v63  ;;  %1619 = vmatpush3.bf16.msra.mxu1 %v1616_v54  ;;  %v1624_v61 = vpack.c.bf16 %v836_v60, %v835_v59 }
 0x214   : > { %1621 = vmatprep.subr.bf16.mxu1 %v1620_v58 }
 0x216   : > { %1559 = vmatpush3.bf16.msra.mxu0 %v1556_v63  ;;  %v1253_v63 = vld [vmem:[%s2450_s4] ss:$0 sm:$0xff] }
 0x217   : > { %1561 = vmatprep.subr.bf16.mxu0 %v1560_v5  ;;  %1623 = vmatpush3.bf16.msra.mxu1 %v1620_v58 }
 0x218   : > { %1625 = vmatprep.subr.bf16.mxu1 %v1624_v61 }
 0x219   : > { %1405 = vmatmul.mubr.msk.f32.vlgmr.msra.gmra.mrb[0].mxu0 %vm357_vm0, %v486_v2 }
 0x21a   : > { %1563 = vmatpush3.bf16.msra.mxu0 %v1560_v5 }
 0x21b   : > { %1565 = vmatprep.subr.bf16.mxu0 %v1564_v11 }
 0x21e   : > { %1567 = vmatpush3.bf16.msra.mxu0 %v1564_v11 }
 0x21f   : > { %1569 = vmatprep.subr.bf16.mxu0 %v1568_v17 }
 0x222   : > { %1571 = vmatpush3.bf16.msra.mxu0 %v1568_v17 }
 0x223   : > { %1573 = vmatprep.subr.bf16.mxu0 %v1572_v25 }
 0x226   : > { %1575 = vmatpush3.bf16.msra.mxu0 %v1572_v25 }
 0x227   : > { %1577 = vmatprep.subr.bf16.mxu0 %v1576_v31 }
 0x22a   : > { %1579 = vmatpush3.bf16.msra.mxu0 %v1576_v31 }
 0x22b   : > { %1581 = vmatprep.subr.bf16.mxu0 %v1580_v38 }
 0x22e   : > { %1583 = vmatpush3.bf16.msra.mxu0 %v1580_v38  ;;  %v839_v38 = vld [vmem:[#allocation10 + $0x120] sm:$0xff] }
 0x22f   : > { %1585 = vmatprep.subr.bf16.mxu0 %v1584_v44  ;;  %v1632_v8 = vpack.c.bf16 %v840_v45, %v839_v38 }
 0x232   : > { %1587 = vmatpush3.bf16.msra.mxu0 %v1584_v44  ;;  %v846_v44 = vld [vmem:[#allocation10 + $0x158] sm:$0xff] }
 0x233   : > { %1589 = vmatprep.subr.bf16.mxu0 %v1588_v51  ;;  %v1644_v46 = vpack.c.bf16 %v846_v44, %v845_v43 }
 0x236   : > { %1591 = vmatpush3.bf16.msra.mxu0 %v1588_v51  ;;  %v850_v51 = vld [vmem:[#allocation10 + $0x178] sm:$0xff] }
 0x237   : > { %v1652_v52 = vpack.c.bf16 %v850_v51, %v849_v50 }
 0x2ec   : > { %v1406_v0 = vpop.f32.mrb[0].mxu0 }
 0x2ed   : > { %v766_v1 = vadd.f32 %v1406_v0, %v1253_v63  ;;  %v747_v2 = vpop.f32.mrb[1].mxu0 }
 0x2ee   : > { %v765_v3 = vadd.f32 %v1253_v63, %v747_v2 }
 0x2ef   : > { %v1255_v4 = vmul.f32 -1.442695, %v766_v1 }
 0x2f0   : > { %v1254_v5 = vmul.f32 -1.442695, %v765_v3 }
 0x2f1   : > { %1760 = vpow2.f32 %v1255_v4 }
 0x2f2   : > { %1762 = vpow2.f32 %v1254_v5 }
 0x2fb   : > { %v1761_v9 = vpop.eup %1760 }
 0x2fc   : > { %v1763_v10 = vpop.eup %1762  ;;  %v774_v11 = vadd.f32 1.0, %v1761_v9 }
 0x2fd   : > { %v773_v12 = vadd.f32 1.0, %v1763_v10 }
 0x2fe   : > { %1764 = vrcp.f32 %v774_v11 }
 0x2ff   : > { %1766 = vrcp.f32 %v773_v12 }
 0x308   : > { %v1765_v13 = vpop.eup %1764 }
 0x309   : > { %v1767_v14 = vpop.eup %1766  ;;  %v780_v15 = vmul.f32 %v1765_v13, %v766_v1 }
 0x30a   : > { %v779_v16 = vmul.f32 %v1767_v14, %v765_v3 }
 0x30b   : > { %v782_v17 = vrot.slane %v780_v15, 7  ;;  %v786_v18 = vrot.slane %v780_v15, 1 }
 0x30c   : > { %1439 = vmatprep.mubr.f32.mxu0 %v779_v16  ;;  %v781_v19 = vrot.slane %v779_v16, 7  ;;  %v785_v21 = vrot.slane %v779_v16, 1 }
 0x30d   : > { %1440 = vmatmul.mubr.f32.vlgmr.msra.gmra.mrb[2].mxu0 %v780_v15 }
 0x30e   : > { %v784_v22 = vsel %vm407_vm3, %v782_v17, %v781_v19  ;;  %v787_v24 = vsel %vm412_vm1, %v785_v21, %v786_v18  ;;  %v783_v25 = vsel %vm407_vm3, %v781_v19, %v782_v17  ;;  %v788_v26 = vsel %vm412_vm1, %v786_v18, %v785_v21 }
 0x30f   : > { %v789_v29 = vsel %vm443_vm12, %v784_v22, 0.0  ;;  %v791_v30 = vsel %vm455_vm11, %v787_v24, 0.0  ;;  %v795_v31 = vsel %vm469_vm15, %v784_v22, 0.0  ;;  %v797_v32 = vsel %vm481_vm2, %v787_v24, 0.0 }
 0x310   : > { %v793_v33 = vadd.f32 %v791_v30, %v789_v29  ;;  %v790_v35 = vsel %vm444_vm13, %v783_v25, 0.0  ;;  %v792_v6 = vsel %vm456_vm14, %v788_v26, 0.0  ;;  %v796_v23 = vsel %vm470_vm4, %v783_v25, 0.0 }
 0x311   : > { %v794_v36 = vadd.f32 %v792_v6, %v790_v35  ;;  %v798_v7 = vsel %vm482_vm5, %v788_v26, 0.0  ;;  %v799_v37 = vadd.f32 %v797_v32, %v795_v31 }
 0x312   : > { %1474 = vmatprep.mubr.f32.mxu1 %v793_v33  ;;  %v800_v39 = vadd.f32 %v798_v7, %v796_v23 }
 0x313   : > { %1475 = vmatmul.mubr.f32.vlgmr.msra.gmra.mrb[0].mxu1 %v794_v36 }
 0x314   : > { %1627 = vmatpush3.bf16.msra.mxu1 %v1624_v61  ;;  %1509 = vmatprep.mubr.f32.mxu1 %v799_v37 }
 0x315   : > { %1629 = vmatprep.subr.bf16.mxu1 %v1628_v34 }
 0x318   : > { %1631 = vmatpush3.bf16.msra.mxu1 %v1628_v34 }
 0x319   : > { %1633 = vmatprep.subr.bf16.mxu1 %v1632_v8 }
 0x31c   : > { %1635 = vmatpush3.bf16.msra.mxu1 %v1632_v8 }
 0x31d   : > { %1637 = vmatprep.subr.bf16.mxu1 %v1636_v56 }
 0x320   : > { %1639 = vmatpush3.bf16.msra.mxu1 %v1636_v56 }
 0x321   : > { %1641 = vmatprep.subr.bf16.mxu1 %v1640_v62 }
 0x324   : > { %1643 = vmatpush3.bf16.msra.mxu1 %v1640_v62 }
 0x325   : > { %1645 = vmatprep.subr.bf16.mxu1 %v1644_v46 }
 0x328   : > { %1647 = vmatpush3.bf16.msra.mxu1 %v1644_v46 }
 0x329   : > { %1649 = vmatprep.subr.bf16.mxu1 %v1648_v49 }
 0x32c   : > { %1651 = vmatpush3.bf16.msra.mxu1 %v1648_v49 }
 0x32d   : > { %1653 = vmatprep.subr.bf16.mxu1 %v1652_v52 }
 0x330   : > { %1655 = vmatpush3.bf16.msra.mxu1 %v1652_v52 }
 0x333   : > { %1510 = vmatmul.mubr.f32.vlgmr.msra.gmra.mrb[0].mxu1 %v800_v39 }
 0x3e0   : > { %v1441_v53 = vpop.f32.mrb[2].mxu0 }
 0x3e1   : > { %v917_v54 = vpop.f32.mrb[3].mxu0 }
 0x406   : > { %v1511_v55 = vpop.f32.mrb[0].mxu1 }
 0x407   : > { %v1656_v58 = vadd.f32 %v1511_v55, %v1441_v53  ;;  %v1067_v59 = vpop.f32.mrb[1].mxu1 }
 0x408   : > { %v1657_v60 = vadd.f32 %v1067_v59, %v917_v54 }
 0x409   : > { %v1086_v61 = vadd.f32 %v1656_v58, %v1256_v57 }
 0x40a   : > { %v1085_v63 = vadd.f32 %v1657_v60, %v1256_v57 }
 0x40b   : > { %v1258_v0 = vmul.f32 -1.442695, %v1086_v61 }
 0x40c   : > { %v1257_v1 = vmul.f32 -1.442695, %v1085_v63 }
 0x40d   : > { %1768 = vpow2.f32 %v1258_v0 }
 0x40e   : > { %1770 = vpow2.f32 %v1257_v1 }
 0x417   : > { %v1769_v2 = vpop.eup %1768 }
 0x418   : > { %v1771_v3 = vpop.eup %1770  ;;  %v1094_v4 = vadd.f32 1.0, %v1769_v2 }
 0x419   : > { %v1093_v5 = vadd.f32 1.0, %v1771_v3 }
 0x41a   : > { %1772 = vrcp.f32 %v1094_v4 }
 0x41b   : > { %1774 = vrcp.f32 %v1093_v5 }
 0x424   : > { %v1773_v9 = vpop.eup %1772 }
 0x425   : > { %v1775_v10 = vpop.eup %1774  ;;  %v1100_v11 = vmul.f32 %v1773_v9, %v1086_v61 }
 0x426   : > { %v1099_v12 = vmul.f32 %v1775_v10, %v1085_v63 }
 0x427   : > { %1102 = vst [vmem:[%s354_s11 + $0x8] sm:$0xff] %v1100_v11 }
 0x428   : > { %1101 = vst [vmem:[%s354_s11] sm:$0xff] %v1099_v12 }
 0x429   : > { %1931 = shalt.err (!%p1928_p13)
}
 0x42a   : > { %s1932_s30 = scalar_lea.hbm %s2402_s18, 256  ;;  %s1936_s15 = scalar_lea.hbm %s2453_s7, 512 }
 0x42b   : > { %p1933_p9 = scmp.ne.s32.totalorder %s2402_s18, %s1932_s30  ;;  %p1937_p4 = scmp.lt.u32.totalorder %s2402_s18, %s2453_s7 }
 0x42c   : > { %p1938_p8 = scmp.lt.u32.totalorder %s1936_s15, %s1932_s30  ;;  %p1940_p3 = scmp.lt.u32.totalorder %s1932_s30, %s2402_s18 }
 0x42d   : > { %p1934_p0 = pnand %p1933_p9, %p2216_p10 }
 0x42e   : > { %p1939_p6 = por %p1938_p8, %p1937_p4 }
 0x42f   : > { %p1935_p11 = pneg %p1934_p0 }
 0x430   : > { %p1941_p5 = por %p1940_p3, %p1939_p6 }
 0x432   : > { %p1942_p7 = pnand %p1941_p5, %p1935_p11 }
 0x434   : > { %1945 = shalt.err (!%p1942_p7)
}
 0x435   : > { %s2003_s21 = smov 128   ;;  %s2004_s23 = smov 8  }
 0x436   : > { %1682 = dma.vmem_to_hbm [thread:$0]  (%p2216_p10), %s2397_s14, 256, %s2402_s18, %s1104_s10, %s2003_s21, %s2003_s21, %s2004_s23  }
 0x437 PF: > { %s2473_s29 = sld [smem:[#allocation16_spill]]  ;;  %s1132_s28 = sand.u32 1, %s1980_s24  }
 0x438   : > { %p2475_p1 = scmp.ge.s32.totalorder %s1992_s27, 2  ;;  %s1133_s16 = scalar_lea.sflag [#allocation4], %s1132_s28 }
 0x43d   : > { %p2474_p12 = scmp.ne.s32.totalorder %s2473_s29, 0 }
 0x43f   : > { %p1702_p2 = pnand %p2475_p1, %p2474_p12 }
 0x441   : > { %1975 = dma.done.wait (!%p1702_p2), %s1133_s16, 256  }
 0x442   : > { %1977 = vsyncadd (!%p1702_p2), %s1133_s16, 4294967040  ;;  %p22_p13 = scmp.ge.s32.totalorder %s2206_s22, 4   ;;  %s2476_s24 = smov %s1984_s25 }
 0x443   : > { %s2477_s25 = smov %s1988_s26  ;;  %s2478_s26 = smov %s2222_s20 }
 0x444   : > { %s2479_s27 = smov %s2206_s22  ;;  %24 = sbr.rel (!%p22_p13) target bundleno = 7 (0x7), region = 113 }
 0x44b   :  { %1138 = vsyncpa [#allocation3], 1 }
 0x44c   :  { %1140 = vsyncpa [#allocation3 + $0x1], 1 }
 0x44d   :  { %1141 = vsyncpa [#allocation6], 1 }
 0x44e   :  { %1142 = vsyncpa [#allocation9], 1 }
 0x44f   :  { %1143 = vsyncpa [#allocation4], 1 }
 0x450   :  { %1145 = vsyncpa [#allocation4 + $0x1], 1 }

</bundles_post_ra>
